<compile_context>
chip_gen: v7x
topology: tpu7x:2x2x1
jax: 0.10.0
libtpu: 0.0.40
codegen_flags: <defaults>
</compile_context>

<pallas_src>
import math
import functools

import jax
import jax.numpy as jnp
from jax.experimental import pallas as pl
from jax.experimental.pallas import tpu as pltpu


def _fused_mha_kernel(x_ref, z_ref, wq_ref, bq_ref, wkv_ref, bkv_ref,
                      wp_ref, bp_ref, mask_ref, o_ref, *, H, Datt, Dmid):
    """One grid step == one batch element; all intermediates stay in VMEM."""
    x = x_ref[0]                        # (Tx, Dx)
    z = z_ref[0]                        # (Tz, Dz)

    # All-head projections as single wide (lane-dense) MXU matmuls.
    # wq is pre-scaled by 1/sqrt(Datt) host-side.
    q_all = jnp.dot(x, wq_ref[...], preferred_element_type=jnp.float32) + bq_ref[...]    # (Tx, H*Datt)
    kv_all = jnp.dot(z, wkv_ref[...], preferred_element_type=jnp.float32) + bkv_ref[...]  # (Tz, H*(Datt+Dmid))

    k_all = kv_all[:, :H * Datt]        # (Tz, H*Datt)
    v_all = kv_all[:, H * Datt:]        # (Tz, H*Dmid)
    mask_add = mask_ref[...]            # (Tx, Tz) additive mask: 0 or -1e30

    y_heads = []
    for h in range(H):                  # H is small & static -> unrolled at trace time
        q = q_all[:, h * Datt:(h + 1) * Datt]       # (Tx, Datt)
        k = k_all[:, h * Datt:(h + 1) * Datt]       # (Tz, Datt)
        v = v_all[:, h * Dmid:(h + 1) * Dmid]       # (Tz, Dmid)

        # scores = q @ k^T — contraction fed directly to the MXU, no transpose op.
        s = jax.lax.dot_general(q, k,
                                dimension_numbers=(((1,), (1,)), ((), ())),
                                preferred_element_type=jnp.float32)
        s = s + mask_add                             # masked, already scaled

        m = jnp.max(s, axis=-1, keepdims=True)
        e = jnp.exp(s - m)
        inv = pl.reciprocal(jnp.sum(e, axis=-1, keepdims=True), approx=True)
        a = e * inv                                  # softmax(dim=-1)
        y_heads.append(jnp.dot(a, v, preferred_element_type=jnp.float32))

    # torch.cat(y_heads, dim=-1) followed by the output projection, on-chip.
    y_concat = jnp.concatenate(y_heads, axis=-1)     # (Tx, H*Dmid)
    o_ref[0] = (jnp.dot(y_concat, wp_ref[...], preferred_element_type=jnp.float32)
                + bp_ref[...])


@jax.jit
def multi_head_attention(x, z, Wq, bq, Wk, bk, Wv, bv, Wp, bp, mask):
    N, Tx, Dx = x.shape
    _, Tz, Dz = z.shape
    H, _, Datt = Wq.shape
    Dmid = Wv.shape[-1]
    Dout = Wp.shape[-1]

    # ---- one-time weight folding (heads -> lane dimension, head-major) ------
    scale = 1.0 / math.sqrt(Datt)
    Wq_f = jnp.transpose(Wq, (1, 0, 2)).reshape(Dx, H * Datt) * scale
    bq_f = bq.reshape(1, H * Datt) * scale
    Wk_f = jnp.transpose(Wk, (1, 0, 2)).reshape(Dz, H * Datt)
    bk_f = bk.reshape(1, H * Datt)
    Wv_f = jnp.transpose(Wv, (1, 0, 2)).reshape(Dz, H * Dmid)
    bv_f = bv.reshape(1, H * Dmid)
    Wkv_f = jnp.concatenate([Wk_f, Wv_f], axis=-1)   # (Dz, H*(Datt+Dmid))
    bkv_f = jnp.concatenate([bk_f, bv_f], axis=-1)   # (1,  H*(Datt+Dmid))
    # Additive mask: 0 where attended, large-negative where masked (matches the
    # reference's -inf masking for any row with >=1 unmasked entry, but keeps a
    # fully-masked row from producing NaN inside the kernel).
    mask_add = jnp.where(mask, 0.0, -1e30).astype(jnp.float32)

    flops = N * (2 * Tx * Dx * H * Datt
                 + 2 * Tz * Dz * (H * Datt + H * Dmid)
                 + 2 * H * Tx * Tz * Datt
                 + 2 * H * Tx * Tz * Dmid
                 + 2 * Tx * H * Dmid * Dout)
    bytes_accessed = 4 * (x.size + z.size + Wq_f.size + bq_f.size + Wkv_f.size
                          + bkv_f.size + Wp.size + bp.size + mask_add.size
                          + N * Tx * Dout)

    kernel = functools.partial(_fused_mha_kernel, H=H, Datt=Datt, Dmid=Dmid)
    return pl.pallas_call(
        kernel,
        out_shape=jax.ShapeDtypeStruct((N, Tx, Dout), jnp.float32),
        grid_spec=pltpu.PrefetchScalarGridSpec(
            num_scalar_prefetch=0,
            grid=(N,),
            in_specs=[
                pl.BlockSpec((1, Tx, Dx),             lambda b: (b, 0, 0)),  # x
                pl.BlockSpec((1, Tz, Dz),             lambda b: (b, 0, 0)),  # z
                pl.BlockSpec((Dx, H * Datt),          lambda b: (0, 0)),     # Wq (pre-scaled)
                pl.BlockSpec((1, H * Datt),           lambda b: (0, 0)),     # bq (pre-scaled)
                pl.BlockSpec((Dz, H * (Datt + Dmid)), lambda b: (0, 0)),     # [Wk|Wv]
                pl.BlockSpec((1, H * (Datt + Dmid)),  lambda b: (0, 0)),     # [bk|bv]
                pl.BlockSpec((H * Dmid, Dout),        lambda b: (0, 0)),     # Wp
                pl.BlockSpec((1, Dout),               lambda b: (0, 0)),     # bp
                pl.BlockSpec((Tx, Tz),                lambda b: (0, 0)),     # additive mask
            ],
            out_specs=pl.BlockSpec((1, Tx, Dout), lambda b: (b, 0, 0)),
        ),
        compiler_params=pltpu.CompilerParams(
            dimension_semantics=("parallel",)),
        cost_estimate=pl.CostEstimate(flops=flops,
                                      transcendentals=N * H * Tx * (Tz + 1),
                                      bytes_accessed=bytes_accessed),
    )(x, z, Wq_f, bq_f, Wkv_f, bkv_f, Wp, bp, mask_add)


def _reference(x, z, Wq, bq, Wk, bk, Wv, bv, Wp, bp, mask):
    """Plain-JAX mirror of the PyTorch forward pass (for verification)."""
    Datt = Wq.shape[-1]
    heads = []
    for h in range(Wq.shape[0]):
        Q = x @ Wq[h] + bq[h]
        K = z @ Wk[h] + bk[h]
        V = z @ Wv[h] + bv[h]
        S = jnp.einsum('bxd,bzd->bxz', Q, K)
        S = jnp.where(mask[None], S, -jnp.inf)
        A = jax.nn.softmax(S / jnp.sqrt(Datt), axis=-1)
        heads.append(jnp.einsum('bxz,bzd->bxd', A, V))
    y_concat = jnp.concatenate(heads, axis=-1)
    return y_concat @ Wp + bp


if __name__ == "__main__":
    # Small shapes consistent with the module's forward pass.
    N, Tx, Tz = 2, 8, 8
    Dx, Dz = 32, 32
    Datt, Dmid, Dout = 16, 16, 32
    H = 4

    key = jax.random.PRNGKey(0)
    ks = jax.random.split(key, 10)

    x = jax.random.normal(ks[0], (N, Tx, Dx), jnp.float32)
    z = jax.random.normal(ks[1], (N, Tz, Dz), jnp.float32)

    # Deterministic synthetic parameters (stacked per-head linear layers).
    Wq = jax.random.normal(ks[2], (H, Dx, Datt), jnp.float32) / math.sqrt(Dx)
    bq = jax.random.normal(ks[3], (H, 1, Datt), jnp.float32) * 0.1
    Wk = jax.random.normal(ks[4], (H, Dz, Datt), jnp.float32) / math.sqrt(Dz)
    bk = jax.random.normal(ks[5], (H, 1, Datt), jnp.float32) * 0.1
    Wv = jax.random.normal(ks[6], (H, Dz, Dmid), jnp.float32) / math.sqrt(Dz)
    bv = jax.random.normal(ks[7], (H, 1, Dmid), jnp.float32) * 0.1
    Wp = jax.random.normal(ks[8], (H * Dmid, Dout), jnp.float32) / math.sqrt(H * Dmid)
    bp = jax.random.normal(ks[9], (1, Dout), jnp.float32) * 0.1

    # Causal boolean mask (Tx x Tz), like the `mask` passed to the module.
    mask = jnp.tril(jnp.ones((Tx, Tz), dtype=bool))

    y = multi_head_attention(x, z, Wq, bq, Wk, bk, Wv, bv, Wp, bp, mask)
    y = jax.block_until_ready(y)

    y_ref = _reference(x, z, Wq, bq, Wk, bk, Wv, bv, Wp, bp, mask)
    assert y.shape == (N, Tx, Dout)
    # Tolerance slightly relaxed for the EUP approximate reciprocal in softmax.
    assert jnp.allclose(y, y_ref, rtol=2e-3, atol=2e-3), "mismatch vs reference"

    print("KERNEL_OK")
</pallas_src>

<mosaic_0001>
module attributes {stable_mosaic.version = 11 : i64} {
  func.func @_fused_mha_kernel(%arg0: i32, %arg1: memref<1x8x32xf32, #tpu.memory_space<vmem>>, %arg2: memref<1x8x32xf32, #tpu.memory_space<vmem>>, %arg3: memref<32x64xf32, #tpu.memory_space<vmem>>, %arg4: memref<1x64xf32, #tpu.memory_space<vmem>>, %arg5: memref<32x128xf32, #tpu.memory_space<vmem>>, %arg6: memref<1x128xf32, #tpu.memory_space<vmem>>, %arg7: memref<64x32xf32, #tpu.memory_space<vmem>>, %arg8: memref<1x32xf32, #tpu.memory_space<vmem>>, %arg9: memref<8x8xf32, #tpu.memory_space<vmem>>, %arg10: memref<1x8x32xf32, #tpu.memory_space<vmem>>) attributes {dimension_semantics = [#tpu.dimension_semantics<parallel>], iteration_bounds = array<i64: 2>, scalar_prefetch = 0 : i64, scratch_operands = 0 : i64, tpu.core_type = #tpu.core_type<tc>, window_params = [{transform_indices = @transform_0, window_bounds = array<i64: 1, 8, 32>}, {transform_indices = @transform_1, window_bounds = array<i64: 1, 8, 32>}, {pipeline_mode = #tpu.pipeline_mode<synchronous>, transform_indices = @transform_2, window_bounds = array<i64: 32, 64>}, {pipeline_mode = #tpu.pipeline_mode<synchronous>, transform_indices = @transform_3, window_bounds = array<i64: 1, 64>}, {pipeline_mode = #tpu.pipeline_mode<synchronous>, transform_indices = @transform_4, window_bounds = array<i64: 32, 128>}, {pipeline_mode = #tpu.pipeline_mode<synchronous>, transform_indices = @transform_5, window_bounds = array<i64: 1, 128>}, {pipeline_mode = #tpu.pipeline_mode<synchronous>, transform_indices = @transform_6, window_bounds = array<i64: 64, 32>}, {pipeline_mode = #tpu.pipeline_mode<synchronous>, transform_indices = @transform_7, window_bounds = array<i64: 1, 32>}, {pipeline_mode = #tpu.pipeline_mode<synchronous>, transform_indices = @transform_8, window_bounds = array<i64: 8, 8>}, {transform_indices = @transform_9, window_bounds = array<i64: 1, 8, 32>}]} {
    %c0 = arith.constant 0 : index
    %c0_0 = arith.constant 0 : index
    %c0_1 = arith.constant 0 : index
    %0 = vector.load %arg1[%c0, %c0_0, %c0_1] : memref<1x8x32xf32, #tpu.memory_space<vmem>>, vector<1x8x32xf32>
    %1 = vector.shape_cast %0 : vector<1x8x32xf32> to vector<8x32xf32>
    %c0_2 = arith.constant 0 : index
    %c0_3 = arith.constant 0 : index
    %c0_4 = arith.constant 0 : index
    %2 = vector.load %arg2[%c0_2, %c0_3, %c0_4] : memref<1x8x32xf32, #tpu.memory_space<vmem>>, vector<1x8x32xf32>
    %3 = vector.shape_cast %2 : vector<1x8x32xf32> to vector<8x32xf32>
    %c0_5 = arith.constant 0 : index
    %c0_6 = arith.constant 0 : index
    %4 = vector.load %arg3[%c0_5, %c0_6] : memref<32x64xf32, #tpu.memory_space<vmem>>, vector<32x64xf32>
    %cst = arith.constant dense<0.000000e+00> : vector<8x64xf32>
    %5 = tpu.matmul %1, %4, %cst {dimension_numbers = #tpu.dot_dimension_numbers<[1], [0], [0], [1], [0, 0, 1, 1], [], []>} : vector<8x32xf32>, vector<32x64xf32>, vector<8x64xf32> -> vector<8x64xf32>
    %c0_7 = arith.constant 0 : index
    %c0_8 = arith.constant 0 : index
    %6 = vector.load %arg4[%c0_7, %c0_8] : memref<1x64xf32, #tpu.memory_space<vmem>>, vector<1x64xf32>
    %7 = vector.broadcast %6 : vector<1x64xf32> to vector<8x64xf32>
    %8 = arith.addf %5, %7 : vector<8x64xf32>
    %c0_9 = arith.constant 0 : index
    %c0_10 = arith.constant 0 : index
    %9 = vector.load %arg5[%c0_9, %c0_10] : memref<32x128xf32, #tpu.memory_space<vmem>>, vector<32x128xf32>
    %cst_11 = arith.constant dense<0.000000e+00> : vector<8x128xf32>
    %10 = tpu.matmul %3, %9, %cst_11 {dimension_numbers = #tpu.dot_dimension_numbers<[1], [0], [0], [1], [0, 0, 1, 1], [], []>} : vector<8x32xf32>, vector<32x128xf32>, vector<8x128xf32> -> vector<8x128xf32>
    %c0_12 = arith.constant 0 : index
    %c0_13 = arith.constant 0 : index
    %11 = vector.load %arg6[%c0_12, %c0_13] : memref<1x128xf32, #tpu.memory_space<vmem>>, vector<1x128xf32>
    %12 = vector.broadcast %11 : vector<1x128xf32> to vector<8x128xf32>
    %13 = arith.addf %10, %12 : vector<8x128xf32>
    %14 = vector.extract_strided_slice %13 {offsets = [0, 0], sizes = [8, 64], strides = [1, 1]} : vector<8x128xf32> to vector<8x64xf32>
    %15 = vector.extract_strided_slice %13 {offsets = [0, 64], sizes = [8, 64], strides = [1, 1]} : vector<8x128xf32> to vector<8x64xf32>
    %c0_14 = arith.constant 0 : index
    %c0_15 = arith.constant 0 : index
    %16 = vector.load %arg9[%c0_14, %c0_15] : memref<8x8xf32, #tpu.memory_space<vmem>>, vector<8x8xf32>
    %17 = vector.extract_strided_slice %8 {offsets = [0, 0], sizes = [8, 16], strides = [1, 1]} : vector<8x64xf32> to vector<8x16xf32>
    %18 = vector.extract_strided_slice %14 {offsets = [0, 0], sizes = [8, 16], strides = [1, 1]} : vector<8x64xf32> to vector<8x16xf32>
    %19 = vector.extract_strided_slice %15 {offsets = [0, 0], sizes = [8, 16], strides = [1, 1]} : vector<8x64xf32> to vector<8x16xf32>
    %cst_16 = arith.constant dense<0.000000e+00> : vector<8x8xf32>
    %20 = tpu.matmul %17, %18, %cst_16 {dimension_numbers = #tpu.dot_dimension_numbers<[1], [1], [0], [0], [0, 0, 1, 0], [], []>} : vector<8x16xf32>, vector<8x16xf32>, vector<8x8xf32> -> vector<8x8xf32>
    %21 = arith.addf %20, %16 : vector<8x8xf32>
    %cst_17 = arith.constant dense<0xFF800000> : vector<8xf32>
    %22 = vector.multi_reduction <maximumf>, %21, %cst_17 [1] : vector<8x8xf32> to vector<8xf32>
    %23 = vector.shape_cast %22 : vector<8xf32> to vector<8x1xf32>
    %24 = vector.broadcast %23 : vector<8x1xf32> to vector<8x8xf32>
    %25 = arith.subf %21, %24 : vector<8x8xf32>
    %26 = math.exp %25 : vector<8x8xf32>
    %cst_18 = arith.constant dense<0.000000e+00> : vector<8xf32>
    %27 = vector.multi_reduction <add>, %26, %cst_18 [1] : vector<8x8xf32> to vector<8xf32>
    %28 = vector.shape_cast %27 : vector<8xf32> to vector<8x1xf32>
    %29 = tpu.reciprocal %28 {approx = true} : vector<8x1xf32> -> vector<8x1xf32>
    %30 = vector.broadcast %29 : vector<8x1xf32> to vector<8x8xf32>
    %31 = arith.mulf %26, %30 : vector<8x8xf32>
    %cst_19 = arith.constant dense<0.000000e+00> : vector<8x16xf32>
    %32 = tpu.matmul %31, %19, %cst_19 {dimension_numbers = #tpu.dot_dimension_numbers<[1], [0], [0], [1], [0, 0, 1, 1], [], []>} : vector<8x8xf32>, vector<8x16xf32>, vector<8x16xf32> -> vector<8x16xf32>
    %33 = vector.extract_strided_slice %8 {offsets = [0, 16], sizes = [8, 16], strides = [1, 1]} : vector<8x64xf32> to vector<8x16xf32>
    %34 = vector.extract_strided_slice %14 {offsets = [0, 16], sizes = [8, 16], strides = [1, 1]} : vector<8x64xf32> to vector<8x16xf32>
    %35 = vector.extract_strided_slice %15 {offsets = [0, 16], sizes = [8, 16], strides = [1, 1]} : vector<8x64xf32> to vector<8x16xf32>
    %cst_20 = arith.constant dense<0.000000e+00> : vector<8x8xf32>
    %36 = tpu.matmul %33, %34, %cst_20 {dimension_numbers = #tpu.dot_dimension_numbers<[1], [1], [0], [0], [0, 0, 1, 0], [], []>} : vector<8x16xf32>, vector<8x16xf32>, vector<8x8xf32> -> vector<8x8xf32>
    %37 = arith.addf %36, %16 : vector<8x8xf32>
    %cst_21 = arith.constant dense<0xFF800000> : vector<8xf32>
    %38 = vector.multi_reduction <maximumf>, %37, %cst_21 [1] : vector<8x8xf32> to vector<8xf32>
    %39 = vector.shape_cast %38 : vector<8xf32> to vector<8x1xf32>
    %40 = vector.broadcast %39 : vector<8x1xf32> to vector<8x8xf32>
    %41 = arith.subf %37, %40 : vector<8x8xf32>
    %42 = math.exp %41 : vector<8x8xf32>
    %cst_22 = arith.constant dense<0.000000e+00> : vector<8xf32>
    %43 = vector.multi_reduction <add>, %42, %cst_22 [1] : vector<8x8xf32> to vector<8xf32>
    %44 = vector.shape_cast %43 : vector<8xf32> to vector<8x1xf32>
    %45 = tpu.reciprocal %44 {approx = true} : vector<8x1xf32> -> vector<8x1xf32>
    %46 = vector.broadcast %45 : vector<8x1xf32> to vector<8x8xf32>
    %47 = arith.mulf %42, %46 : vector<8x8xf32>
    %cst_23 = arith.constant dense<0.000000e+00> : vector<8x16xf32>
    %48 = tpu.matmul %47, %35, %cst_23 {dimension_numbers = #tpu.dot_dimension_numbers<[1], [0], [0], [1], [0, 0, 1, 1], [], []>} : vector<8x8xf32>, vector<8x16xf32>, vector<8x16xf32> -> vector<8x16xf32>
    %49 = vector.extract_strided_slice %8 {offsets = [0, 32], sizes = [8, 16], strides = [1, 1]} : vector<8x64xf32> to vector<8x16xf32>
    %50 = vector.extract_strided_slice %14 {offsets = [0, 32], sizes = [8, 16], strides = [1, 1]} : vector<8x64xf32> to vector<8x16xf32>
    %51 = vector.extract_strided_slice %15 {offsets = [0, 32], sizes = [8, 16], strides = [1, 1]} : vector<8x64xf32> to vector<8x16xf32>
    %cst_24 = arith.constant dense<0.000000e+00> : vector<8x8xf32>
    %52 = tpu.matmul %49, %50, %cst_24 {dimension_numbers = #tpu.dot_dimension_numbers<[1], [1], [0], [0], [0, 0, 1, 0], [], []>} : vector<8x16xf32>, vector<8x16xf32>, vector<8x8xf32> -> vector<8x8xf32>
    %53 = arith.addf %52, %16 : vector<8x8xf32>
    %cst_25 = arith.constant dense<0xFF800000> : vector<8xf32>
    %54 = vector.multi_reduction <maximumf>, %53, %cst_25 [1] : vector<8x8xf32> to vector<8xf32>
    %55 = vector.shape_cast %54 : vector<8xf32> to vector<8x1xf32>
    %56 = vector.broadcast %55 : vector<8x1xf32> to vector<8x8xf32>
    %57 = arith.subf %53, %56 : vector<8x8xf32>
    %58 = math.exp %57 : vector<8x8xf32>
    %cst_26 = arith.constant dense<0.000000e+00> : vector<8xf32>
    %59 = vector.multi_reduction <add>, %58, %cst_26 [1] : vector<8x8xf32> to vector<8xf32>
    %60 = vector.shape_cast %59 : vector<8xf32> to vector<8x1xf32>
    %61 = tpu.reciprocal %60 {approx = true} : vector<8x1xf32> -> vector<8x1xf32>
    %62 = vector.broadcast %61 : vector<8x1xf32> to vector<8x8xf32>
    %63 = arith.mulf %58, %62 : vector<8x8xf32>
    %cst_27 = arith.constant dense<0.000000e+00> : vector<8x16xf32>
    %64 = tpu.matmul %63, %51, %cst_27 {dimension_numbers = #tpu.dot_dimension_numbers<[1], [0], [0], [1], [0, 0, 1, 1], [], []>} : vector<8x8xf32>, vector<8x16xf32>, vector<8x16xf32> -> vector<8x16xf32>
    %65 = vector.extract_strided_slice %8 {offsets = [0, 48], sizes = [8, 16], strides = [1, 1]} : vector<8x64xf32> to vector<8x16xf32>
    %66 = vector.extract_strided_slice %14 {offsets = [0, 48], sizes = [8, 16], strides = [1, 1]} : vector<8x64xf32> to vector<8x16xf32>
    %67 = vector.extract_strided_slice %15 {offsets = [0, 48], sizes = [8, 16], strides = [1, 1]} : vector<8x64xf32> to vector<8x16xf32>
    %cst_28 = arith.constant dense<0.000000e+00> : vector<8x8xf32>
    %68 = tpu.matmul %65, %66, %cst_28 {dimension_numbers = #tpu.dot_dimension_numbers<[1], [1], [0], [0], [0, 0, 1, 0], [], []>} : vector<8x16xf32>, vector<8x16xf32>, vector<8x8xf32> -> vector<8x8xf32>
    %69 = arith.addf %68, %16 : vector<8x8xf32>
    %cst_29 = arith.constant dense<0xFF800000> : vector<8xf32>
    %70 = vector.multi_reduction <maximumf>, %69, %cst_29 [1] : vector<8x8xf32> to vector<8xf32>
    %71 = vector.shape_cast %70 : vector<8xf32> to vector<8x1xf32>
    %72 = vector.broadcast %71 : vector<8x1xf32> to vector<8x8xf32>
    %73 = arith.subf %69, %72 : vector<8x8xf32>
    %74 = math.exp %73 : vector<8x8xf32>
    %cst_30 = arith.constant dense<0.000000e+00> : vector<8xf32>
    %75 = vector.multi_reduction <add>, %74, %cst_30 [1] : vector<8x8xf32> to vector<8xf32>
    %76 = vector.shape_cast %75 : vector<8xf32> to vector<8x1xf32>
    %77 = tpu.reciprocal %76 {approx = true} : vector<8x1xf32> -> vector<8x1xf32>
    %78 = vector.broadcast %77 : vector<8x1xf32> to vector<8x8xf32>
    %79 = arith.mulf %74, %78 : vector<8x8xf32>
    %cst_31 = arith.constant dense<0.000000e+00> : vector<8x16xf32>
    %80 = tpu.matmul %79, %67, %cst_31 {dimension_numbers = #tpu.dot_dimension_numbers<[1], [0], [0], [1], [0, 0, 1, 1], [], []>} : vector<8x8xf32>, vector<8x16xf32>, vector<8x16xf32> -> vector<8x16xf32>
    %81 = tpu.concatenate %32, %48, %64, %80 in 1 : vector<8x16xf32>, vector<8x16xf32>, vector<8x16xf32>, vector<8x16xf32> -> vector<8x64xf32>
    %c0_32 = arith.constant 0 : index
    %c0_33 = arith.constant 0 : index
    %82 = vector.load %arg7[%c0_32, %c0_33] : memref<64x32xf32, #tpu.memory_space<vmem>>, vector<64x32xf32>
    %cst_34 = arith.constant dense<0.000000e+00> : vector<8x32xf32>
    %83 = tpu.matmul %81, %82, %cst_34 {dimension_numbers = #tpu.dot_dimension_numbers<[1], [0], [0], [1], [0, 0, 1, 1], [], []>} : vector<8x64xf32>, vector<64x32xf32>, vector<8x32xf32> -> vector<8x32xf32>
    %c0_35 = arith.constant 0 : index
    %c0_36 = arith.constant 0 : index
    %84 = vector.load %arg8[%c0_35, %c0_36] : memref<1x32xf32, #tpu.memory_space<vmem>>, vector<1x32xf32>
    %85 = vector.broadcast %84 : vector<1x32xf32> to vector<8x32xf32>
    %86 = arith.addf %83, %85 : vector<8x32xf32>
    %c0_37 = arith.constant 0 : index
    %c0_38 = arith.constant 0 : index
    %c0_39 = arith.constant 0 : index
    %87 = vector.load %arg10[%c0_37, %c0_38, %c0_39] : memref<1x8x32xf32, #tpu.memory_space<vmem>>, vector<1x8x32xf32>
    %88 = vector.shape_cast %87 : vector<1x8x32xf32> to vector<8x32xf32>
    %89 = vector.shape_cast %86 : vector<8x32xf32> to vector<1x8x32xf32>
    tpu.vector_store %arg10[%c0_37, %c0_38, %c0_39], %89 {strides = array<i32>} : memref<1x8x32xf32, #tpu.memory_space<vmem>>, vector<1x8x32xf32>,
    return
  }
  func.func @transform_0(%arg0: i32) -> (i32, i32, i32) {
    %c0_i32 = arith.constant 0 : i32
    %c0_i32_0 = arith.constant 0 : i32
    %c0_i32_1 = arith.constant 0 : i32
    return %arg0, %c0_i32, %c0_i32_0 : i32, i32, i32
  }
  func.func @transform_1(%arg0: i32) -> (i32, i32, i32) {
    %c0_i32 = arith.constant 0 : i32
    %c0_i32_0 = arith.constant 0 : i32
    %c0_i32_1 = arith.constant 0 : i32
    return %arg0, %c0_i32, %c0_i32_0 : i32, i32, i32
  }
  func.func @transform_2(%arg0: i32) -> (i32, i32) {
    %c0_i32 = arith.constant 0 : i32
    %c0_i32_0 = arith.constant 0 : i32
    %c0_i32_1 = arith.constant 0 : i32
    return %c0_i32, %c0_i32_0 : i32, i32
  }
  func.func @transform_3(%arg0: i32) -> (i32, i32) {
    %c0_i32 = arith.constant 0 : i32
    %c0_i32_0 = arith.constant 0 : i32
    %c0_i32_1 = arith.constant 0 : i32
    return %c0_i32, %c0_i32_0 : i32, i32
  }
  func.func @transform_4(%arg0: i32) -> (i32, i32) {
    %c0_i32 = arith.constant 0 : i32
    %c0_i32_0 = arith.constant 0 : i32
    %c0_i32_1 = arith.constant 0 : i32
    return %c0_i32, %c0_i32_0 : i32, i32
  }
  func.func @transform_5(%arg0: i32) -> (i32, i32) {
    %c0_i32 = arith.constant 0 : i32
    %c0_i32_0 = arith.constant 0 : i32
    %c0_i32_1 = arith.constant 0 : i32
    return %c0_i32, %c0_i32_0 : i32, i32
  }
  func.func @transform_6(%arg0: i32) -> (i32, i32) {
    %c0_i32 = arith.constant 0 : i32
    %c0_i32_0 = arith.constant 0 : i32
    %c0_i32_1 = arith.constant 0 : i32
    return %c0_i32, %c0_i32_0 : i32, i32
  }
  func.func @transform_7(%arg0: i32) -> (i32, i32) {
    %c0_i32 = arith.constant 0 : i32
    %c0_i32_0 = arith.constant 0 : i32
    %c0_i32_1 = arith.constant 0 : i32
    return %c0_i32, %c0_i32_0 : i32, i32
  }
  func.func @transform_8(%arg0: i32) -> (i32, i32) {
    %c0_i32 = arith.constant 0 : i32
    %c0_i32_0 = arith.constant 0 : i32
    %c0_i32_1 = arith.constant 0 : i32
    return %c0_i32, %c0_i32_0 : i32, i32
  }
  func.func @transform_9(%arg0: i32) -> (i32, i32, i32) {
    %c0_i32 = arith.constant 0 : i32
    %c0_i32_0 = arith.constant 0 : i32
    %c0_i32_1 = arith.constant 0 : i32
    return %arg0, %c0_i32, %c0_i32_0 : i32, i32, i32
  }
}

</mosaic_0001>

<bundles_post_ra>
// kernel: multi_head_attention.1
= control target key start
LH: loop header
LB: loop body
LE: loop exit
PB: predicated region body
PF: predicated region fallthrough
CT: control target
= control target key end

     0   :  { %14 = vsyncpa [#allocation3], 0  ;;  %s1969_s0 = inlined_call_operand.vmem [shape: f32[2,8,32], index: 0, kind: input, shape index: {}]   ;;  %s1970_s1 = inlined_call_operand.vmem [shape: f32[2,8,32], index: 1, kind: input, shape index: {}]   ;;  %s1971_s2 = inlined_call_operand.vmem [shape: f32[32,64], index: 2, kind: input, shape index: {}]   ;;  %s1972_s3 = inlined_call_operand.vmem [shape: f32[1,64], index: 3, kind: input, shape index: {}]   ;;  %s1973_s4 = inlined_call_operand.vmem [shape: f32[32,128], index: 4, kind: input, shape index: {}]   ;;  %s1974_s5 = inlined_call_operand.vmem [shape: f32[1,128], index: 5, kind: input, shape index: {}]   ;;  %s1975_s6 = inlined_call_operand.vmem [shape: f32[64,32], index: 6, kind: input, shape index: {}]   ;;  %s1976_s7 = inlined_call_operand.vmem [shape: f32[1,32], index: 7, kind: input, shape index: {}]   ;;  %s1977_s8 = inlined_call_operand.vmem [shape: f32[8,8], index: 8, kind: input, shape index: {}]   ;;  %s1978_s9 = inlined_call_operand.hbm [shape: f32[2,8,32], index: 9, kind: output, shape index: {}]  }
   0x1   :  { %16 = vsyncpa [#allocation3 + $0x1], 0  ;;  %s1727_s30 = smov 0   ;;  %s1729_s10 = smov 0  }
   0x2   :  { %s1731_s11 = smov 0   ;;  %s1733_s12 = smov 0  }
   0x3 LB: > { %s1748_s13 = sadd.s32 4294967295, %s1664_s12   ;;  %s1368_s14 = sadd.s32 4294967294, %s1664_s12   ;;  %s1664_s12 = sphi %s1733_s12, %s1984_s12   ;;  %s1660_s11 = sphi %s1731_s11, %s1983_s11   ;;  %s1656_s10 = sphi %s1729_s10, %s1982_s10   ;;  %s1652_s30 = sphi %s1727_s30, %s1981_s30  }
   0x4   : > { %s1752_s15 = sadd.s32 1, %s1664_s12   ;;  %s228_s16 = sadd.s32 1, %s1660_s11 }
   0x5   : > { %s225_s17 = ssub.s32 %s1664_s12, %s1752_s15  ;;  %p238_p0 = scmp.ne.s32.totalorder %s1660_s11, %s1656_s10 }
   0x6   : > { %p226_p1 = scmp.eq.s32.totalorder %s225_s17, 0  ;;  %p239_p2 = scmp.eq.s32.totalorder %s1748_s13, 1 }
   0x7   : > { %p244_p3 = scmp.ne.s32.totalorder %s1656_s10, %s1652_s30  ;;  %p245_p4 = scmp.eq.s32.totalorder %s1368_s14, 1 }
   0x8   : > { %s1763_s18 = scalar_select %p226_p1, %s1660_s11, %s228_s16  }
   0x9   : > { %p1765_p5 = por %p239_p2, %p238_p0  ;;  %p1769_p6 = por %p245_p4, %p244_p3 }
   0xa   : > { %p1371_p7 = scmp.ge.s32.totalorder %s1664_s12, 1  ;;  %p298_p8 = scmp.lt.s32.totalorder %s1664_s12, 3 }
   0xc   : > { %p299_p9 = pnand %p1371_p7, %p298_p8 }
   0xd   : > { %v347_v0 = vld [vmem:[%s1971_s2] sm:$0xff] (!%p299_p9)  ;;  %v348_v1 = vld [vmem:[%s1971_s2 + $0x8] sm:$0xff] (!%p299_p9)  ;;  %v349_v2 = vld [vmem:[%s1971_s2 + $0x10] sm:$0xff] (!%p299_p9)  ;;  %v1666_v3 = vmov (!%p299_p9), 0.0|0.0   ;;  %vm1667_vm0 = vmmov (!%p299_p9), 0   ;;  %v1668_v6 = vmov (!%p299_p9), 0.0  }
   0xe   : > { %302 = sbr.rel (%p299_p9) target bundleno = 1460 (0x5b4), region = 56  ;;  %1513 = vmatprep.subr.bf16.mxu1 (!%p299_p9), %v1666_v3  ;;  %v1514_v4 = vpack.c.bf16 (!%p299_p9), %v348_v1, %v347_v0  ;;  %v350_v5 = vld [vmem:[%s1971_s2 + $0x18] sm:$0xff] (!%p299_p9)  ;;  %1440 = vmatprep.mubr.msk.f32.mxu1 (!%p299_p9), %vm1667_vm0, %v1668_v6  ;;  %p337_p10 = scmp.lt.s32.totalorder (!%p299_p9), %s1748_s13, 1  ;;  %v432_v8 = vld [vmem:[%s1973_s4] sm:$0xff] (!%p299_p9)  ;;  %v433_v9 = vld [vmem:[%s1973_s4 + $0x8] sm:$0xff] (!%p299_p9)  ;;  %vm358_vm1 = vcmask (!%p299_p9), 261120  }
   0xf   : > { %1454 = vmatprep.subr.mxu0 (!%p299_p9), %v1668_v6  ;;  %1456 = vmatprep.mubr.msk.f32.mxu0 (!%p299_p9), %vm1667_vm0, %v1668_v6  ;;  %v1517_v7 = vpack.c.bf16 (!%p299_p9), %v350_v5, %v349_v2  ;;  %v1520_v11 = vpack.c.bf16 (!%p299_p9), %v433_v9, %v432_v8  ;;  %v434_v12 = vld [vmem:[%s1973_s4 + $0x10] sm:$0xff] (!%p299_p9)  ;;  %v435_v13 = vld [vmem:[%s1973_s4 + $0x18] sm:$0xff] (!%p299_p9)  ;;  %v1377_v18 = vld [vmem:[%s1974_s5] ss:$0 sm:$0xff] (!%p299_p9)  ;;  %vm517_vm2 = vcmask (!%p299_p9), 130048   ;;  %s1670_s26 = smov (!%p299_p9), 112  }
  0x10   : > { %1515 = vmatpush3.bf16.msra.mxu1 (!%p299_p9), %v1514_v4  ;;  %v1523_v14 = vpack.c.bf16 (!%p299_p9), %v435_v13, %v434_v12  ;;  %v1375_v22 = vld [vmem:[%s1972_s3] ss:$0 sm:$0xff] (!%p299_p9)  ;;  %s1671_s27 = smov (!%p299_p9), 80   ;;  %vm594_vm3 = vcmask (!%p299_p9), 64512   ;;  %s1673_s16 = smov (!%p299_p9), 32   ;;  %vm1191_vm4 = vcmask (!%p299_p9), 392192  }
  0x11   : > { %1516 = vmatprep.subr.bf16.mxu1 (!%p299_p9), %v1666_v3  ;;  %v516_v30 = vld [vmem:[%s1977_s8] sm:$0xff] (!%p299_p9)  ;;  %s1675_s21 = smov (!%p299_p9), 48   ;;  %vm1208_vm5 = vcmask (!%p299_p9), 523264  }
  0x14   : > { %1518 = vmatpush3.bf16.msra.mxu1 (!%p299_p9), %v1517_v7 }
  0x15   : > { %s338_s29 = scalar_select %p337_p10, %s1748_s13, 1  ;;  %1519 = vmatprep.subr.bf16.mxu1 %v1666_v3 }
  0x17   : > { %s1373_s22 = sshll.u32 %s338_s29, 3  ;;  %s1672_s29 = smov 64  }
  0x18   : > { %s340_s25 = scalar_lea.vmem %s1969_s0, %s1373_s22  ;;  %s344_s17 = scalar_lea.vmem %s1970_s1, %s1373_s22 }
  0x19   : > { %v345_v10 = vld [vmem:[%s340_s25] sm:$0xff]  ;;  %s1669_s25 = smov 96  }
  0x1a   : > { %1441 = vmatmul.mubr.msk.f32.vlgmr.msra.gmra.mrb[0].mxu1 %vm358_vm1, %v345_v10  ;;  %v346_v15 = vld [vmem:[%s344_s17] sm:$0xff]  ;;  %s1674_s17 = smov 16  }
  0x1b   : > { %1521 = vmatpush3.bf16.msra.mxu1 %v1520_v11  ;;  %1451 = vmatprep.mubr.msk.f32.mxu1 %vm1667_vm0, %v1668_v6 }
  0x1c   : > { %1522 = vmatprep.subr.bf16.mxu1 %v1666_v3 }
  0x1f   : > { %1524 = vmatpush3.bf16.msra.mxu1 %v1523_v14 }
  0x20   : > { %1459 = vmatprep.subr.mxu1 %v1668_v6 }
  0x22   : > { %1452 = vmatmul.mubr.msk.f32.vlgmr.msra.gmra.mrb[2].mxu1 %vm358_vm1, %v346_v15 }
  0x23   : > { %1461 = vmatprep.mubr.msk.f32.mxu1 %vm1667_vm0, %v1668_v6 }
  0xed   : > { %v428_v16 = vpop.f32.mrb[0].mxu1 }
  0xee   : > { %v1442_v17 = vpop.f32.mrb[1].mxu1  ;;  %v429_v23 = vadd.f32 %v1375_v22, %v428_v16  ;;  %v1194_v22 = vld [vmem:[%s1975_s6 + $0x8] sm:$0xff] }
  0xf5   : > { %v512_v19 = vpop.f32.mrb[2].mxu1 }
  0xf6   : > { %v1826_v20 = vadd.f32 %v1377_v18, %v512_v19  ;;  %v1453_v21 = vpop.f32.mrb[3].mxu1 }
  0xf7   : > { %v1193_v21 = vld [vmem:[%s1975_s6] sm:$0xff] }
  0xf8   : > { %849 = vrot.lane.b32.xlu1 %v1826_v20, %s1669_s25  ;;  %684 = vrot.lane.b32.xlu0 %v1826_v20, %s1670_s26 }
  0xf9   : > { %1455 = vmatpush3.xpose.msk.msra.mxu0 %vm517_vm2, %v1826_v20 }
  0xfa   : > { %1464 = vmatprep.subr.mxu0 %v1668_v6 }
  0xfc   : > { %1457 = vmatmul.mubr.msk.f32.vlgmr.msra.gmra.mrb[0].mxu0 %vm517_vm2, %v429_v23  ;;  %847 = vrot.lane.b32.xlu1 %v429_v23, %s1669_s25 }
  0xfd   : > { %682 = vrot.lane.b32.xlu0 %v429_v23, %s1670_s26  ;;  %1466 = vmatprep.mubr.msk.f32.mxu0 %vm1667_vm0, %v1668_v6 }
 0x100   : > { %1012 = vrot.lane.b32.xlu1 %v429_v23, %s1671_s27  ;;  %v1195_v23 = vld [vmem:[%s1975_s6 + $0x10] sm:$0xff] }
 0x101   : > { %1014 = vrot.lane.b32.xlu0 %v1826_v20, %s1671_s27 }
 0x16a   : > { %v685_v24 = vpop.permute.xlu0 %684  ;;  %v850_v25 = vpop.permute.xlu1 %849 }
 0x16b   : > { %1465 = vmatpush3.xpose.msk.msra.mxu0 %vm517_vm2, %v685_v24  ;;  %v1526_v24 = vpack.c.bf16 %v1194_v22, %v1193_v21 }
 0x16c   : > { %1474 = vmatprep.subr.mxu0 %v1668_v6 }
 0x16e   : > { %v848_v27 = vpop.permute.xlu1 %847 }
 0x16f   : > { %v683_v26 = vpop.permute.xlu0 %682 }
 0x170   : > { %1467 = vmatmul.mubr.msk.f32.vlgmr.msra.gmra.mrb[2].mxu0 %vm517_vm2, %v683_v26 }
 0x171   : > { %1475 = vmatpush3.xpose.msk.msra.mxu0 %vm517_vm2, %v850_v25  ;;  %1476 = vmatprep.mubr.msk.f32.mxu0 %vm1667_vm0, %v1668_v6 }
 0x172   : > { %1484 = vmatprep.subr.mxu0 %v1668_v6  ;;  %v1013_v29 = vpop.permute.xlu1 %1012 }
 0x173   : > { %v1015_v28 = vpop.permute.xlu0 %1014 }
 0x174   : > { %1477 = vmatmul.mubr.msk.f32.vlgmr.msra.gmra.mrb[4].mxu0 %vm517_vm2, %v848_v27 }
 0x175   : > { %1485 = vmatpush3.xpose.msk.msra.mxu0 %vm517_vm2, %v1015_v28  ;;  %1486 = vmatprep.mubr.msk.f32.mxu0 %vm1667_vm0, %v1668_v6  ;;  %v1197_v28 = vld [vmem:[%s1975_s6 + $0x20] sm:$0xff] }
 0x176   : > { %1525 = vmatprep.subr.bf16.mxu0 %v1666_v3 }
 0x178   : > { %1487 = vmatmul.mubr.msk.f32.vlgmr.msra.gmra.mrb[6].mxu0 %vm517_vm2, %v1013_v29  ;;  %v1198_v29 = vld [vmem:[%s1975_s6 + $0x28] sm:$0xff] }
 0x179   : > { %1510 = vmatprep.mubr.msk.f32.mxu0 %vm1667_vm0, %v1668_v6  ;;  %1527 = vmatpush3.bf16.msra.mxu0 %v1526_v24 }
 0x17a   : > { %1528 = vmatprep.subr.bf16.mxu0 %v1666_v3 }
 0x1cf   : > { %v590_v31 = vpop.f32.mrb[0].mxu0 }
 0x1d0   : > { %v591_v32 = vadd.f32 %v590_v31, %v516_v30  ;;  %v1458_v33 = vpop.f32.mrb[1].mxu0  ;;  %v1199_v31 = vld [vmem:[%s1975_s6 + $0x30] sm:$0xff] }
 0x1d2   : > { %v595_v34 = vsel %vm594_vm3, %v591_v32, -inf }
 0x1d3   : > { %596 = vmax.xlane.f32.xlu0 %v595_v34 }
 0x243   : > { %v756_v35 = vpop.f32.mrb[2].mxu0 }
 0x244   : > { %v757_v36 = vadd.f32 %v756_v35, %v516_v30  ;;  %v1468_v37 = vpop.f32.mrb[3].mxu0 }
 0x246   : > { %v760_v38 = vsel %vm594_vm3, %v757_v36, -inf }
 0x247   : > { %761 = vmax.xlane.f32.xlu1 %v760_v38  ;;  %v921_v39 = vpop.f32.mrb[4].mxu0 }
 0x248   : > { %v922_v40 = vadd.f32 %v921_v39, %v516_v30  ;;  %v1478_v41 = vpop.f32.mrb[5].mxu0 }
 0x24a   : > { %v925_v42 = vsel %vm594_vm3, %v922_v40, -inf }
 0x24b   : > { %926 = vmax.xlane.f32.xlu0 %v925_v42  ;;  %v1086_v43 = vpop.f32.mrb[6].mxu0 }
 0x24c   : > { %v1087_v44 = vadd.f32 %v1086_v43, %v516_v30  ;;  %v1488_v45 = vpop.f32.mrb[7].mxu0  ;;  %v1532_v30 = vpack.c.bf16 %v1198_v29, %v1197_v28 }
 0x24d   : > { %v1391_v45 = vld [vmem:[%s1976_s7] ss:$0 sm:$0xff] }
 0x24e   : > { %v1090_v46 = vsel %vm594_vm3, %v1087_v44, -inf }
 0x24f   : > { %1091 = vmax.xlane.f32.xlu0 %v1090_v46 }
 0x258   : > { %606 = vrot.lane.b32.xlu1 %v1826_v20, %s1672_s29 }
 0x260   : > { %v597_v47 = vpop.xlane.xlu0 %596 }
 0x261   : > { %v598_v48 = vsub.f32 %v591_v32, %v597_v47  ;;  %v1200_v32 = vld [vmem:[%s1975_s6 + $0x38] sm:$0xff] }
 0x262   : > { %v1535_v33 = vpack.c.bf16 %v1200_v32, %v1199_v31 }
 0x263   : > { %v599_v49 = vmul.f32 1.442695, %v598_v48 }
 0x265   : > { %1586 = vpow2.f32 %v599_v49 }
 0x26f   : > { %v1587_v50 = vpop.eup %1586 }
 0x270   : > { %v601_v51 = vsel %vm594_vm3, %v1587_v50, 0.0 }
 0x27c   : > { %602 = vadd.xlane.f32.xlu1 %v601_v51 }
 0x2d4   : > { %v762_v52 = vpop.xlane.xlu1 %761 }
 0x2d5   : > { %v763_v53 = vsub.f32 %v757_v36, %v762_v52 }
 0x2d7   : > { %v764_v54 = vmul.f32 1.442695, %v763_v53 }
 0x2d8   : > { %v607_v55 = vpop.permute.xlu1 %606  ;;  %v927_v56 = vpop.xlane.xlu0 %926 }
 0x2d9   : > { %1588 = vpow2.f32 %v764_v54  ;;  %v928_v57 = vsub.f32 %v922_v40, %v927_v56  ;;  %1460 = vmatpush3.msra.mxu1 %v607_v55 }
 0x2da   : > { %1469 = vmatprep.subr.mxu1 %v1668_v6 }
 0x2db   : > { %v929_v58 = vmul.f32 1.442695, %v928_v57 }
 0x2dc   : > { %v1092_v59 = vpop.xlane.xlu0 %1091 }
 0x2dd   : > { %1590 = vpow2.f32 %v929_v58  ;;  %v1093_v60 = vsub.f32 %v1087_v44, %v1092_v59 }
 0x2df   : > { %v1094_v61 = vmul.f32 1.442695, %v1093_v60 }
 0x2e1   : > { %1592 = vpow2.f32 %v1094_v61 }
 0x2e3   : > { %v1589_v62 = vpop.eup %1588 }
 0x2e4   : > { %v766_v63 = vsel %vm594_vm3, %v1589_v62, 0.0 }
 0x2e5   : > { %767 = vadd.xlane.f32.xlu0 %v766_v63 }
 0x2e7   : > { %v1591_v0 = vpop.eup %1590 }
 0x2e8   : > { %v931_v1 = vsel %vm594_vm3, %v1591_v0, 0.0 }
 0x2e9   : > { %932 = vadd.xlane.f32.xlu1 %v931_v1 }
 0x2eb   : > { %v1593_v2 = vpop.eup %1592 }
 0x2ec   : > { %v1096_v4 = vsel %vm594_vm3, %v1593_v2, 0.0 }
 0x2ed   : > { %1097 = vadd.xlane.f32.xlu0 %v1096_v4 }
 0x2fa   : > { %936 = vrot.lane.b32.xlu1 %v1826_v20, %s1673_s16 }
 0x2fe   : > { %1101 = vrot.lane.b32.xlu1 %v1826_v20, %s1674_s17 }
 0x303   : > { %771 = vrot.lane.b32.xlu0 %v1826_v20, %s1675_s21 }
 0x309   : > { %v603_v5 = vpop.xlane.xlu1 %602 }
 0x30a   : > { %1594 = vrcp.f32 %v603_v5 }
 0x314   : > { %v1595_v7 = vpop.eup %1594 }
 0x315   : > { %v605_v8 = vmul.f32 %v1595_v7, %v1587_v50 }
 0x317   : > { %1462 = vmatmul.mubr.msk.f32.vlgmr.msra.gmra.mrb[4].mxu1 %vm594_vm3, %v605_v8 }
 0x318   : > { %1471 = vmatprep.mubr.msk.f32.mxu1 %vm1667_vm0, %v1668_v6 }
 0x372   : > { %v768_v9 = vpop.xlane.xlu0 %767 }
 0x373   : > { %1596 = vrcp.f32 %v768_v9 }
 0x376   : > { %v933_v10 = vpop.xlane.xlu1 %932 }
 0x377   : > { %1598 = vrcp.f32 %v933_v10 }
 0x37a   : > { %v1098_v11 = vpop.xlane.xlu0 %1097  ;;  %v937_v14 = vpop.permute.xlu1 %936 }
 0x37b   : > { %1600 = vrcp.f32 %v1098_v11 }
 0x37d   : > { %v1597_v12 = vpop.eup %1596 }
 0x37e   : > { %v770_v13 = vmul.f32 %v1597_v12, %v1589_v62  ;;  %v772_v15 = vpop.permute.xlu0 %771  ;;  %v1102_v18 = vpop.permute.xlu1 %1101 }
 0x37f   : > { %1470 = vmatpush3.msra.mxu1 %v772_v15 }
 0x380   : > { %1472 = vmatmul.mubr.msk.f32.vlgmr.msra.gmra.mrb[6].mxu1 %vm594_vm3, %v770_v13  ;;  %1479 = vmatprep.subr.mxu1 %v1668_v6 }
 0x381   : > { %v1599_v16 = vpop.eup %1598  ;;  %1480 = vmatpush3.msra.mxu1 %v937_v14  ;;  %1481 = vmatprep.mubr.msk.f32.mxu1 %vm1667_vm0, %v1668_v6 }
 0x382   : > { %v935_v17 = vmul.f32 %v1599_v16, %v1591_v0  ;;  %1489 = vmatprep.subr.mxu1 %v1668_v6 }
 0x384   : > { %1482 = vmatmul.mubr.msk.f32.vlgmr.msra.gmra.mrb[8].mxu1 %vm594_vm3, %v935_v17 }
 0x385   : > { %v1601_v19 = vpop.eup %1600  ;;  %1490 = vmatpush3.msra.mxu1 %v1102_v18  ;;  %1491 = vmatprep.mubr.msk.f32.mxu1 %vm1667_vm0, %v1668_v6  ;;  %v1196_v6 = vld [vmem:[%s1975_s6 + $0x18] sm:$0xff] }
 0x386   : > { %v1100_v20 = vmul.f32 %v1601_v19, %v1593_v2  ;;  %v1529_v25 = vpack.c.bf16 %v1196_v6, %v1195_v23 }
 0x388   : > { %1492 = vmatmul.mubr.msk.f32.vlgmr.msra.gmra.mrb[10].mxu1 %vm594_vm3, %v1100_v20  ;;  %1530 = vmatpush3.bf16.msra.mxu0 %v1529_v25 }
 0x389   : > { %1531 = vmatprep.subr.bf16.mxu0 %v1666_v3 }
 0x38c   : > { %1533 = vmatpush3.bf16.msra.mxu0 %v1532_v30 }
 0x38d   : > { %1534 = vmatprep.subr.bf16.mxu0 %v1666_v3 }
 0x390   : > { %1536 = vmatpush3.bf16.msra.mxu0 %v1535_v33 }
 0x3ea   : > { %v678_v26 = vpop.f32.mrb[4].mxu1 }
 0x3eb   : > { %v1463_v27 = vpop.f32.mrb[5].mxu1 }
 0x453   : > { %v843_v34 = vpop.f32.mrb[6].mxu1 }
 0x454   : > { %1178 = vrot.lane.b32.xlu0 %v843_v34, %s1674_s17  ;;  %v1473_v35 = vpop.f32.mrb[7].mxu1  ;;  %s334_s17 = sand.u32 1, %s1656_s10  }
 0x455   : > { %s1284_s27 = scalar_lea.sflag [#allocation3], %s334_s17 }
 0x457   : > { %v1008_v36 = vpop.f32.mrb[8].mxu1 }
 0x458   : > { %1182 = vrot.lane.b32.xlu1 %v1008_v36, %s1673_s16  ;;  %v1483_v37 = vpop.f32.mrb[9].mxu1  ;;  %s1372_s16 = sshll.u32 %s334_s17, 3 }
 0x459   : > { %s336_s23 = scalar_lea.vmem [#allocation2], %s1372_s16 }
 0x45a   : > { %s1297_s22 = sshll.u32 %s336_s23, 4  ;;  %s1928_s22 = int_to_ptr.vmem [resolvable:$true] %s1297_s22 }
 0x45b   : > { %v1173_v3 = vpop.f32.mrb[10].mxu1  ;;  %s1602_s28 = scalar_lea.vmem %s1928_s22, 128 }
 0x45c   : > { %1186 = vrot.lane.b32.xlu0 %v1173_v3, %s1675_s21  ;;  %v1493_v38 = vpop.f32.mrb[11].mxu1  ;;  %s1394_s21 = sshll.u32 %s1748_s13, 7  ;;  %p1603_p11 = scmp.ne.s32.totalorder %s1928_s22, %s1602_s28 }
 0x45d   : > { %s1926_s26 = scalar_lea.hbm %s1978_s9, %s1394_s21  ;;  %s1676_s13 = smov [#allocation2]  }
 0x45e   : > { %p1604_p12 = pnand %p1603_p11, %p1765_p5  ;;  %s1606_s16 = sshll.u32 %s1676_s13, 4  ;;  %s1607_s16 = int_to_ptr.vmem [resolvable:$false] %s1606_s16 }
 0x45f   : > { %s1608_s14 = scalar_lea.vmem %s1607_s16, 256  ;;  %p1609_p0 = scmp.lt.s32.totalorder %s1928_s22, %s1607_s16 }
 0x460   : > { %p1605_p13 = pneg %p1604_p12  ;;  %p1610_p1 = scmp.lt.s32.totalorder %s1608_s14, %s1602_s28 }
 0x462   : > { %p1611_p2 = por %p1610_p1, %p1609_p0 }
 0x464   : > { %p1612_p3 = pnand %p1611_p2, %p1605_p13 }
 0x4c6   : > { %v1179_v39 = vpop.permute.xlu0 %1178 }
 0x4c7   : > { %v1189_v41 = vsel %vm517_vm2, %v678_v26, %v1179_v39 }
 0x4ca   : > { %v1183_v40 = vpop.permute.xlu1 %1182 }
 0x4cb   : > { %v1190_v42 = vsel %vm358_vm1, %v1189_v41, %v1183_v40 }
 0x4ce   : > { %v1187_v43 = vpop.permute.xlu0 %1186 }
 0x4cf   : > { %v1192_v44 = vsel %vm1191_vm4, %v1190_v42, %v1187_v43 }
 0x4d0   : > { %1511 = vmatmul.mubr.msk.f32.vlgmr.msra.gmra.mrb[8].mxu0 %vm1208_vm5, %v1192_v44 }
 0x5a3   : > { %v1278_v46 = vpop.f32.mrb[8].mxu0 }
 0x5a4   : > { %v1279_v47 = vadd.f32 %v1391_v45, %v1278_v46  ;;  %v1512_v48 = vpop.f32.mrb[9].mxu0 }
 0x5a6   : > { %1282 = vst.msk [vmem:[%s336_s23] sm:$0xff] %vm358_vm1, %v1279_v47 }
 0x5a7   : > { %1615 = shalt.err (!%p1612_p3)
}
 0x5a8   : > { %s1616_s17 = scalar_lea.hbm %s1926_s26, 128  ;;  %s1620_s23 = scalar_lea.hbm %s1978_s9, 256 }
 0x5a9   : > { %p1617_p4 = scmp.ne.s32.totalorder %s1926_s26, %s1616_s17  ;;  %p1621_p9 = scmp.lt.u32.totalorder %s1926_s26, %s1978_s9 }
 0x5aa   : > { %p1622_p10 = scmp.lt.u32.totalorder %s1620_s23, %s1616_s17  ;;  %p1624_p12 = scmp.lt.u32.totalorder %s1616_s17, %s1926_s26 }
 0x5ab   : > { %p1618_p7 = pnand %p1617_p4, %p1765_p5 }
 0x5ac   : > { %p1623_p11 = por %p1622_p10, %p1621_p9 }
 0x5ad   : > { %p1619_p8 = pneg %p1618_p7 }
 0x5ae   : > { %p1625_p13 = por %p1624_p12, %p1623_p11 }
 0x5b0   : > { %p1626_p0 = pnand %p1625_p13, %p1619_p8 }
 0x5b2   : > { %1629 = shalt.err (!%p1626_p0)
}
 0x5b3   : > { %1537 = dma.vmem_to_hbm [thread:$0]  (%p1765_p5), %s1928_s22, 128, %s1926_s26, %s1284_s27  }
 0x5b4 PF: > { %p1543_p1 = scmp.ge.s32.totalorder %s1664_s12, 2  ;;  %s1309_s28 = sand.u32 1, %s1652_s30  }
 0x5b5   : > { %s1310_s13 = scalar_lea.sflag [#allocation3], %s1309_s28 }
 0x5b6   : > { %p1540_p2 = pnand %p1543_p1, %p1769_p6 }
 0x5b8   : > { %1647 = dma.done.wait (!%p1540_p2), %s1310_s13, 128  }
 0x5b9   : > { %1649 = vsyncadd (!%p1540_p2), %s1310_s13, 4294967168  ;;  %p19_p3 = scmp.ge.s32.totalorder %s1752_s15, 4   ;;  %s1981_s30 = smov %s1656_s10 }
 0x5ba   : > { %s1982_s10 = smov %s1660_s11  ;;  %s1983_s11 = smov %s1763_s18 }
 0x5bb   : > { %s1984_s12 = smov %s1752_s15  ;;  %21 = sbr.rel (!%p19_p3) target bundleno = 3 (0x3), region = 94 }
 0x5c2   :  { %1315 = vsyncpa [#allocation3], 1 }
 0x5c3   :  { %1317 = vsyncpa [#allocation3 + $0x1], 1 }

</bundles_post_ra>
